<compile_context>
chip_gen: v6e
topology: v6e:2x2x1
jax: 0.10.0
libtpu: 0.0.40
codegen_flags: <defaults>
</compile_context>

<pallas_src>
import jax
import jax.numpy as jnp
from jax.experimental import pallas as pl
from jax.experimental.pallas import tpu as pltpu


def _image_da_kernel(x_ref, w1_ref, w2_ref, o_ref):
    # x_ref : (Cin, TILE_HW)   f32   -- channels on sublane, pixels on lane
    # w1_ref: (HIDDEN, Cin)    bf16  -- VMEM-resident across grid steps
    # w2_ref: (8, HIDDEN)      bf16  -- VMEM-resident, out channels padded 2 -> 8
    # o_ref : (8, TILE_HW)     f32   -- lane-dense output block
    hidden = w1_ref.shape[0]
    tile_hw = x_ref.shape[-1]

    # Bound the per-chunk f32 MXU result (chunk, TILE_HW) to <= 128 KiB (~half the
    # vreg file) so nothing spills; chunk stays a divisor of hidden (=512).
    chunk = min(hidden, max(64, (128 * 1024) // (tile_hw * 4)))
    assert hidden % chunk == 0

    xb = x_ref[...].astype(jnp.bfloat16)            # in-kernel cast, no wrapper pass
    acc = jnp.zeros(o_ref.shape, jnp.float32)       # tiny (8, TILE_HW) register accumulator

    for c in range(hidden // chunk):
        sl = pl.ds(c * chunk, chunk)                # static start -> free slice
        h = jnp.dot(w1_ref[sl, :], xb,
                    preferred_element_type=jnp.float32)        # (chunk, TILE_HW) f32
        h = jnp.maximum(h, 0.0).astype(jnp.bfloat16)           # fused ReLU
        acc = acc + jnp.dot(w2_ref[:, sl], h,
                            preferred_element_type=jnp.float32)  # (8, TILE_HW) f32
    o_ref[...] = acc                                 # single lane-dense store


def image_da_forward(x_nchw, need_backprop, w1_oihw, w2_oihw, *, max_tile_hw=512):
    """Forward pass of _ImageDA (domain logits). grad_reverse is identity in forward."""
    del need_backprop  # only consumed by the (untranslated) label branch
    N, C, H, W = x_nchw.shape
    hidden = w1_oihw.shape[0]
    out_ch = w2_oihw.shape[0]
    assert w1_oihw.shape == (hidden, C, 1, 1)
    assert w2_oihw.shape == (out_ch, hidden, 1, 1)
    assert hidden % 128 == 0 and C % 8 == 0 and out_ch <= 8

    hw = H * W
    # Pick a lane tile (multiple of 128); prefer one that divides H*W so no pad copy.
    tile_hw = None
    for t in (max_tile_hw, 256, 128):
        if t % 128 == 0 and hw % t == 0:
            tile_hw, hw_pad = t, hw
            break
    if tile_hw is None:
        tile_hw = 128
        hw_pad = pl.cdiv(hw, tile_hw) * tile_hw

    # NCHW -> (N, C, H*W): contiguous trailing-dim collapse, no data movement.
    x_flat = x_nchw.reshape(N, C, hw)
    if hw_pad != hw:
        # Zero columns -> zero logits (both convs are bias-free); sliced off below.
        x_flat = jnp.pad(x_flat, ((0, 0), (0, 0), (0, hw_pad - hw)))

    out_sub = 8  # pad the 2 output channels to one sublane group
    # Weights in native OIHW orientation (no transpose); bf16 for the MXU (tiny arrays).
    w1 = w1_oihw[:, :, 0, 0].astype(jnp.bfloat16)                  # (hidden, C)
    w2 = w2_oihw[:, :, 0, 0].astype(jnp.bfloat16)                  # (out_ch, hidden)
    w2 = jnp.pad(w2, ((0, out_sub - out_ch), (0, 0)))              # (8, hidden), zero rows

    out = pl.pallas_call(
        _image_da_kernel,
        out_shape=jax.ShapeDtypeStruct((N, out_sub, hw_pad), jnp.float32),
        grid_spec=pltpu.PrefetchScalarGridSpec(
            num_scalar_prefetch=0,
            grid=(N, hw_pad // tile_hw),
            in_specs=[
                pl.BlockSpec((None, C, tile_hw), lambda n, j: (n, 0, j)),   # pipelined x tile
                pl.BlockSpec((hidden, C), lambda n, j: (0, 0)),             # W1, VMEM-resident
                pl.BlockSpec((out_sub, hidden), lambda n, j: (0, 0)),       # W2, VMEM-resident
            ],
            out_specs=pl.BlockSpec((None, out_sub, tile_hw), lambda n, j: (n, 0, j)),
        ),
        compiler_params=pltpu.CompilerParams(
            dimension_semantics=("parallel", "parallel"),  # megacore sharding on v7x
            vmem_limit_bytes=32 * 1024 * 1024,             # well above actual usage, safe on all gens
        ),
    )(x_flat, w1, w2)

    # Slice the 2 real channels / real pixels back out (tiny copy: 2 ch * H*W * 4 B).
    y = out[:, :out_ch, :hw].reshape(N, out_ch, H, W).astype(x_nchw.dtype)
    # TODO(synk): ImageLabelResizeLayer (the `label` output of _ImageDA.forward) is not
    # defined in the provided spec, so it is not lowered here; only the logits are returned.
    # TODO(synk): grad_reverse is identity in forward; no custom_vjp is emitted, so this
    # function is forward/inference-only (gradient-reversal scaling is not applied).
    return y


if __name__ == "__main__":
    # _ImageDA(dim=64): Conv1 1x1 64->512 (no bias), ReLU, Conv2 1x1 512->2 (no bias).
    N, C, H, W = 2, 64, 16, 16
    HIDDEN, OUT = 512, 2

    key = jax.random.PRNGKey(0)
    kx, k1, k2 = jax.random.split(key, 3)
    x = jax.random.normal(kx, (N, C, H, W), dtype=jnp.float32)

    # PyTorch-default-like kaiming-uniform bounds (fan_in = Cin * 1 * 1).
    b1 = 1.0 / (C ** 0.5)
    b2 = 1.0 / (HIDDEN ** 0.5)
    w1 = jax.random.uniform(k1, (HIDDEN, C, 1, 1), jnp.float32, -b1, b1)
    w2 = jax.random.uniform(k2, (OUT, HIDDEN, 1, 1), jnp.float32, -b2, b2)
    need_backprop = jnp.array([0, 1], jnp.int32)

    y = image_da_forward(x, need_backprop, w1, w2)
    y = jax.block_until_ready(y)

    # Reference: same bf16-product / f32-accumulate math path via plain XLA ops.
    xb = jnp.transpose(x, (0, 2, 3, 1)).reshape(-1, C).astype(jnp.bfloat16)   # (M, C)
    w1b = w1[:, :, 0, 0].astype(jnp.bfloat16)                                  # (512, 64)
    w2b = w2[:, :, 0, 0].astype(jnp.bfloat16)                                  # (2, 512)
    h_ref = jnp.maximum(jnp.dot(xb, w1b.T, preferred_element_type=jnp.float32), 0.0)
    ref = jnp.dot(h_ref.astype(jnp.bfloat16), w2b.T, preferred_element_type=jnp.float32)
    ref = jnp.transpose(ref.reshape(N, H, W, OUT), (0, 3, 1, 2)).astype(x.dtype)

    assert y.shape == (N, OUT, H, W)
    assert jnp.allclose(y, ref, atol=2e-3, rtol=2e-3), float(jnp.max(jnp.abs(y - ref)))
    print("KERNEL_OK")
</pallas_src>

<mosaic_0001>
module attributes {stable_mosaic.version = 11 : i64} {
  func.func @_image_da_kernel(%arg0: i32, %arg1: i32, %arg2: memref<1x64x256xf32, #tpu.memory_space<vmem>>, %arg3: memref<512x64xbf16, #tpu.memory_space<vmem>>, %arg4: memref<8x512xbf16, #tpu.memory_space<vmem>>, %arg5: memref<1x8x256xf32, #tpu.memory_space<vmem>>) attributes {dimension_semantics = [#tpu.dimension_semantics<parallel>, #tpu.dimension_semantics<parallel>], iteration_bounds = array<i64: 2, 1>, scalar_prefetch = 0 : i64, scratch_operands = 0 : i64, tpu.core_type = #tpu.core_type<tc>, window_params = [{transform_indices = @transform_0, window_bounds = array<i64: 1, 64, 256>}, {pipeline_mode = #tpu.pipeline_mode<synchronous>, transform_indices = @transform_1, window_bounds = array<i64: 512, 64>}, {pipeline_mode = #tpu.pipeline_mode<synchronous>, transform_indices = @transform_2, window_bounds = array<i64: 8, 512>}, {transform_indices = @transform_3, window_bounds = array<i64: 1, 8, 256>}]} {
    %c0 = arith.constant 0 : index
    %c0_0 = arith.constant 0 : index
    %c0_1 = arith.constant 0 : index
    %0 = vector.load %arg2[%c0, %c0_0, %c0_1] : memref<1x64x256xf32, #tpu.memory_space<vmem>>, vector<1x64x256xf32>
    %1 = vector.shape_cast %0 : vector<1x64x256xf32> to vector<64x256xf32>
    %2 = arith.truncf %1 : vector<64x256xf32> to vector<64x256xbf16>
    %cst = arith.constant 0.000000e+00 : f32
    %3 = vector.broadcast %cst : f32 to vector<8x256xf32>
    %c0_2 = arith.constant 0 : index
    %c0_3 = arith.constant 0 : index
    %4 = vector.load %arg3[%c0_2, %c0_3] : memref<512x64xbf16, #tpu.memory_space<vmem>>, vector<128x64xbf16>
    %cst_4 = arith.constant dense<0.000000e+00> : vector<128x256xf32>
    %5 = tpu.matmul %4, %2, %cst_4 {dimension_numbers = #tpu.dot_dimension_numbers<[1], [0], [0], [1], [0, 0, 1, 1], [], []>} : vector<128x64xbf16>, vector<64x256xbf16>, vector<128x256xf32> -> vector<128x256xf32>
    %cst_5 = arith.constant 0.000000e+00 : f32
    %6 = vector.broadcast %cst_5 : f32 to vector<128x256xf32>
    %7 = arith.maximumf %5, %6 : vector<128x256xf32>
    %8 = arith.truncf %7 : vector<128x256xf32> to vector<128x256xbf16>
    %c0_6 = arith.constant 0 : index
    %c0_7 = arith.constant 0 : index
    %9 = vector.load %arg4[%c0_6, %c0_7] : memref<8x512xbf16, #tpu.memory_space<vmem>>, vector<8x128xbf16>
    %cst_8 = arith.constant dense<0.000000e+00> : vector<8x256xf32>
    %10 = tpu.matmul %9, %8, %cst_8 {dimension_numbers = #tpu.dot_dimension_numbers<[1], [0], [0], [1], [0, 0, 1, 1], [], []>} : vector<8x128xbf16>, vector<128x256xbf16>, vector<8x256xf32> -> vector<8x256xf32>
    %11 = arith.addf %3, %10 : vector<8x256xf32>
    %c128 = arith.constant 128 : index
    %c0_9 = arith.constant 0 : index
    %12 = vector.load %arg3[%c128, %c0_9] : memref<512x64xbf16, #tpu.memory_space<vmem>>, vector<128x64xbf16>
    %cst_10 = arith.constant dense<0.000000e+00> : vector<128x256xf32>
    %13 = tpu.matmul %12, %2, %cst_10 {dimension_numbers = #tpu.dot_dimension_numbers<[1], [0], [0], [1], [0, 0, 1, 1], [], []>} : vector<128x64xbf16>, vector<64x256xbf16>, vector<128x256xf32> -> vector<128x256xf32>
    %cst_11 = arith.constant 0.000000e+00 : f32
    %14 = vector.broadcast %cst_11 : f32 to vector<128x256xf32>
    %15 = arith.maximumf %13, %14 : vector<128x256xf32>
    %16 = arith.truncf %15 : vector<128x256xf32> to vector<128x256xbf16>
    %c0_12 = arith.constant 0 : index
    %c128_13 = arith.constant 128 : index
    %17 = vector.load %arg4[%c0_12, %c128_13] : memref<8x512xbf16, #tpu.memory_space<vmem>>, vector<8x128xbf16>
    %cst_14 = arith.constant dense<0.000000e+00> : vector<8x256xf32>
    %18 = tpu.matmul %17, %16, %cst_14 {dimension_numbers = #tpu.dot_dimension_numbers<[1], [0], [0], [1], [0, 0, 1, 1], [], []>} : vector<8x128xbf16>, vector<128x256xbf16>, vector<8x256xf32> -> vector<8x256xf32>
    %19 = arith.addf %11, %18 : vector<8x256xf32>
    %c256 = arith.constant 256 : index
    %c0_15 = arith.constant 0 : index
    %20 = vector.load %arg3[%c256, %c0_15] : memref<512x64xbf16, #tpu.memory_space<vmem>>, vector<128x64xbf16>
    %cst_16 = arith.constant dense<0.000000e+00> : vector<128x256xf32>
    %21 = tpu.matmul %20, %2, %cst_16 {dimension_numbers = #tpu.dot_dimension_numbers<[1], [0], [0], [1], [0, 0, 1, 1], [], []>} : vector<128x64xbf16>, vector<64x256xbf16>, vector<128x256xf32> -> vector<128x256xf32>
    %cst_17 = arith.constant 0.000000e+00 : f32
    %22 = vector.broadcast %cst_17 : f32 to vector<128x256xf32>
    %23 = arith.maximumf %21, %22 : vector<128x256xf32>
    %24 = arith.truncf %23 : vector<128x256xf32> to vector<128x256xbf16>
    %c0_18 = arith.constant 0 : index
    %c256_19 = arith.constant 256 : index
    %25 = vector.load %arg4[%c0_18, %c256_19] : memref<8x512xbf16, #tpu.memory_space<vmem>>, vector<8x128xbf16>
    %cst_20 = arith.constant dense<0.000000e+00> : vector<8x256xf32>
    %26 = tpu.matmul %25, %24, %cst_20 {dimension_numbers = #tpu.dot_dimension_numbers<[1], [0], [0], [1], [0, 0, 1, 1], [], []>} : vector<8x128xbf16>, vector<128x256xbf16>, vector<8x256xf32> -> vector<8x256xf32>
    %27 = arith.addf %19, %26 : vector<8x256xf32>
    %c384 = arith.constant 384 : index
    %c0_21 = arith.constant 0 : index
    %28 = vector.load %arg3[%c384, %c0_21] : memref<512x64xbf16, #tpu.memory_space<vmem>>, vector<128x64xbf16>
    %cst_22 = arith.constant dense<0.000000e+00> : vector<128x256xf32>
    %29 = tpu.matmul %28, %2, %cst_22 {dimension_numbers = #tpu.dot_dimension_numbers<[1], [0], [0], [1], [0, 0, 1, 1], [], []>} : vector<128x64xbf16>, vector<64x256xbf16>, vector<128x256xf32> -> vector<128x256xf32>
    %cst_23 = arith.constant 0.000000e+00 : f32
    %30 = vector.broadcast %cst_23 : f32 to vector<128x256xf32>
    %31 = arith.maximumf %29, %30 : vector<128x256xf32>
    %32 = arith.truncf %31 : vector<128x256xf32> to vector<128x256xbf16>
    %c0_24 = arith.constant 0 : index
    %c384_25 = arith.constant 384 : index
    %33 = vector.load %arg4[%c0_24, %c384_25] : memref<8x512xbf16, #tpu.memory_space<vmem>>, vector<8x128xbf16>
    %cst_26 = arith.constant dense<0.000000e+00> : vector<8x256xf32>
    %34 = tpu.matmul %33, %32, %cst_26 {dimension_numbers = #tpu.dot_dimension_numbers<[1], [0], [0], [1], [0, 0, 1, 1], [], []>} : vector<8x128xbf16>, vector<128x256xbf16>, vector<8x256xf32> -> vector<8x256xf32>
    %35 = arith.addf %27, %34 : vector<8x256xf32>
    %c0_27 = arith.constant 0 : index
    %c0_28 = arith.constant 0 : index
    %c0_29 = arith.constant 0 : index
    %36 = vector.load %arg5[%c0_27, %c0_28, %c0_29] : memref<1x8x256xf32, #tpu.memory_space<vmem>>, vector<1x8x256xf32>
    %37 = vector.shape_cast %36 : vector<1x8x256xf32> to vector<8x256xf32>
    %38 = vector.shape_cast %35 : vector<8x256xf32> to vector<1x8x256xf32>
    tpu.vector_store %arg5[%c0_27, %c0_28, %c0_29], %38 {strides = array<i32>} : memref<1x8x256xf32, #tpu.memory_space<vmem>>, vector<1x8x256xf32>,
    return
  }
  func.func @transform_0(%arg0: i32, %arg1: i32) -> (i32, i32, i32) {
    %c0_i32 = arith.constant 0 : i32
    %c0_i32_0 = arith.constant 0 : i32
    return %arg0, %c0_i32, %arg1 : i32, i32, i32
  }
  func.func @transform_1(%arg0: i32, %arg1: i32) -> (i32, i32) {
    %c0_i32 = arith.constant 0 : i32
    %c0_i32_0 = arith.constant 0 : i32
    %c0_i32_1 = arith.constant 0 : i32
    return %c0_i32, %c0_i32_0 : i32, i32
  }
  func.func @transform_2(%arg0: i32, %arg1: i32) -> (i32, i32) {
    %c0_i32 = arith.constant 0 : i32
    %c0_i32_0 = arith.constant 0 : i32
    %c0_i32_1 = arith.constant 0 : i32
    return %c0_i32, %c0_i32_0 : i32, i32
  }
  func.func @transform_3(%arg0: i32, %arg1: i32) -> (i32, i32, i32) {
    %c0_i32 = arith.constant 0 : i32
    %c0_i32_0 = arith.constant 0 : i32
    return %arg0, %c0_i32, %arg1 : i32, i32, i32
  }
}

</mosaic_0001>

<bundles_post_ra>
// kernel: tpu_custom_call.1
= control target key start
LH: loop header
LB: loop body
LE: loop exit
PB: predicated region body
PF: predicated region fallthrough
CT: control target
= control target key end

     0   :  { %8 = vsyncpa [#allocation3], 0  ;;  %s2248_s0 = inlined_call_operand.vmem [shape: f32[2,64,256], index: 0, kind: input, shape index: {}]   ;;  %s2249_s1 = inlined_call_operand.vmem [shape: bf16[512,64], index: 1, kind: input, shape index: {}]   ;;  %s2250_s2 = inlined_call_operand.vmem [shape: bf16[8,512], index: 2, kind: input, shape index: {}]   ;;  %s2251_s3 = inlined_call_operand.hbm [shape: f32[2,8,256], index: 3, kind: output, shape index: {}]  }
   0x1   :  { %10 = vsyncpa [#allocation3 + $0x1], 0  ;;  %s1724_s12 = smov 0   ;;  %s1726_s13 = smov 0  }
   0x2   :  { %s1728_s14 = smov 0   ;;  %s1730_s15 = smov 0  }
   0x3   :  { %s1732_s16 = smov 0   ;;  %s1734_s17 = smov 0  }
   0x4 LB: > { %s1457_s18 = sadd.s32 4294967295, %s1700_s17   ;;  %s1458_s19 = sadd.s32 4294967294, %s1700_s17   ;;  %s1700_s17 = sphi %s1734_s17, %s16_s17   ;;  %s1696_s16 = sphi %s1732_s16, %s2313_s16   ;;  %s1692_s15 = sphi %s1730_s15, %s2312_s15   ;;  %s1688_s14 = sphi %s1728_s14, %s2311_s14   ;;  %s1684_s13 = sphi %s1726_s13, %s2310_s13   ;;  %s1680_s12 = sphi %s1724_s12, %s2309_s12  }
   0x5   : > { %s28_s20 = sadd.s32 1, %s1696_s16  ;;  %s107_s21 = sadd.s32 1, %s1688_s14 }
   0x6   : > { %p30_p0 = scmp.ge.s32.totalorder %s28_s20, 2  ;;  %p117_p1 = scmp.ne.s32.totalorder %s1688_s14, %s1684_s13 }
   0x7   : > { %p118_p2 = scmp.eq.s32.totalorder %s1457_s18, 1  ;;  %p123_p3 = scmp.ne.s32.totalorder %s1684_s13, %s1680_s12 }
   0x8   : > { %s2315_s20 = smov (%p30_p0, %s28_s20), 0  ;;  %p124_p5 = scmp.eq.s32.totalorder %s1458_s19, 1 }
   0x9   : > { %p1764_p4 = por %p118_p2, %p117_p1  ;;  %s102_s23 = ssub.s32 %s1696_s16, %s2315_s20 }
   0xa   : > { %p1461_p6 = scmp.ge.s32.totalorder %s1700_s17, 1  ;;  %p105_p7 = scmp.eq.s32.totalorder %s102_s23, 0 }
   0xb   : > { %p1771_p8 = por %p124_p5, %p123_p3  ;;  %p161_p9 = scmp.lt.s32.totalorder %s1700_s17, 3 }
   0xc   : > { %s1777_s25 = scalar_select %p105_p7, %s1688_s14, %s107_s21  }
   0xd   : > { %p162_p10 = pnand %p1461_p6, %p161_p9 }
   0xf   : > { %165 = sbr.rel (%p162_p10) target bundleno = 1161 (0x489), region = 32 }
  0x14   : > { %p190_p11 = scmp.lt.s32.totalorder %s1692_s15, 1  ;;  %v2252_v0 = vmov 0   ;;  %v1592_v25 = vld [vmem:[%s2249_s1] sm:$0xff]   ;;  %vm281_vm0 = vcmask 523264   ;;  %v1594_v27 = vld [vmem:[%s2249_s1 + $0x8] sm:$0xff]   ;;  %v1596_v29 = vld [vmem:[%s2249_s1 + $0x10] sm:$0xff]  }
  0x15   : > { %338 = vmatprep.mubr.bf16.mxu0 %v2252_v0  ;;  %580 = vmatprep.mubr.bf16.mxu1 %v2252_v0  ;;  %v1593_v26 = vld [vmem:[%s2249_s1 + $0x40] sm:$0xff]   ;;  %v1595_v28 = vld [vmem:[%s2249_s1 + $0x48] sm:$0xff]   ;;  %v1597_v30 = vld [vmem:[%s2249_s1 + $0x50] sm:$0xff]   ;;  %s186_s8 = sand.u32 1, %s1684_s13   ;;  %s1535_s10 = sshll.u32 %s1692_s15, 8 }
  0x16   : > { %s191_s26 = scalar_select %p190_p11, %s1692_s15, 1  ;;  %v1598_v31 = vld [vmem:[%s2249_s1 + $0x18] sm:$0xff]   ;;  %v1600_v33 = vld [vmem:[%s2249_s1 + $0x20] sm:$0xff]   ;;  %v1602_v35 = vld [vmem:[%s2249_s1 + $0x28] sm:$0xff]  }
  0x17   : > { %v1599_v32 = vld [vmem:[%s2249_s1 + $0x58] sm:$0xff]   ;;  %v1601_v34 = vld [vmem:[%s2249_s1 + $0x60] sm:$0xff]   ;;  %v1603_v36 = vld [vmem:[%s2249_s1 + $0x68] sm:$0xff]   ;;  %s1462_s9 = sshll.u32 %s186_s8, 4  ;;  %s2202_s23 = scalar_lea.hbm %s2251_s3, %s1535_s10 }
  0x18   : > { %s1534_s27 = sshll.u32 %s191_s26, 7  ;;  %v1604_v37 = vld [vmem:[%s2249_s1 + $0x30] sm:$0xff]   ;;  %v1606_v39 = vld [vmem:[%s2249_s1 + $0x38] sm:$0xff]   ;;  %s188_s11 = scalar_lea.vmem [#allocation2], %s1462_s9 }
  0x19   : > { %s1786_s30 = scalar_lea.vmem %s2248_s0, %s1534_s27  ;;  %v1605_v38 = vld [vmem:[%s2249_s1 + $0x70] sm:$0xff]   ;;  %v1607_v40 = vld [vmem:[%s2249_s1 + $0x78] sm:$0xff]   ;;  %s1381_s18 = sshll.u32 %s188_s11, 4  ;;  %s2204_s18 = int_to_ptr.vmem [resolvable:$true] %s1381_s18 }
  0x1a   : > { %v214_v1 = vld [vmem:[%s1786_s30 + $0x68] sm:$0xff]  ;;  %v216_v2 = vld [vmem:[%s1786_s30 + $0x78] sm:$0xff]  ;;  %v213_v3 = vld [vmem:[%s1786_s30 + $0x60] sm:$0xff]  ;;  %s1365_s15 = scalar_lea.sflag [#allocation3], %s186_s8  ;;  %s1624_s26 = scalar_lea.vmem %s2204_s18, 256 }
  0x1b   : > { %v1791_v4 = vpack.c.bf16 %v216_v2, %v214_v1  ;;  %v215_v5 = vld [vmem:[%s1786_s30 + $0x70] sm:$0xff]  ;;  %v210_v6 = vld [vmem:[%s1786_s30 + $0x48] sm:$0xff]  ;;  %v212_v7 = vld [vmem:[%s1786_s30 + $0x58] sm:$0xff]  ;;  %p1625_p12 = scmp.ne.s32.totalorder %s2204_s18, %s1624_s26  ;;  %s1703_s27 = smov [#allocation2]  }
  0x1c   : > { %v1796_v8 = vpack.c.bf16 %v215_v5, %v213_v3  ;;  %v1798_v9 = vpack.c.bf16 %v212_v7, %v210_v6  ;;  %v209_v10 = vld [vmem:[%s1786_s30 + $0x40] sm:$0xff]  ;;  %v211_v11 = vld [vmem:[%s1786_s30 + $0x50] sm:$0xff]  ;;  %v206_v12 = vld [vmem:[%s1786_s30 + $0x28] sm:$0xff]  ;;  %s1628_s28 = sshll.u32 %s1703_s27, 4  ;;  %s1629_s28 = int_to_ptr.vmem [resolvable:$false] %s1628_s28 }
  0x1d   : > { %2272 = vst [vmem:[#allocation5_spill] sm:$0xff] %v1791_v4  ;;  %314 = vmatprep.subr.bf16.mxu0 %v1791_v4  ;;  %556 = vmatprep.subr.bf16.mxu1 %v1791_v4  ;;  %v208_v13 = vld [vmem:[%s1786_s30 + $0x38] sm:$0xff]  ;;  %v1808_v14 = vpack.c.bf16 %v211_v11, %v209_v10  ;;  %v205_v15 = vld [vmem:[%s1786_s30 + $0x20] sm:$0xff]  ;;  %v207_v17 = vld [vmem:[%s1786_s30 + $0x30] sm:$0xff]  ;;  %p1626_p13 = pnand %p1625_p12, %p1764_p4  ;;  %s1630_s29 = scalar_lea.vmem %s1629_s28, 512 }
  0x1e   : > { %2273 = vst [vmem:[#allocation6_spill] sm:$0xff] %v1796_v8  ;;  %2274 = vst [vmem:[#allocation7_spill] sm:$0xff] %v1798_v9  ;;  %315 = vmatpush1.bf16.msra.mxu0 %v1796_v8  ;;  %557 = vmatpush1.bf16.msra.mxu1 %v1796_v8  ;;  %v1813_v16 = vpack.c.bf16 %v208_v13, %v206_v12  ;;  %v202_v18 = vld [vmem:[%s1786_s30 + $0x8] sm:$0xff]  ;;  %v204_v19 = vld [vmem:[%s1786_s30 + $0x18] sm:$0xff]  ;;  %v1820_v20 = vpack.c.bf16 %v207_v17, %v205_v15  ;;  %p1631_p1 = scmp.lt.s32.totalorder %s2204_s18, %s1629_s28  ;;  %p1632_p2 = scmp.lt.s32.totalorder %s1630_s29, %s1624_s26 }
  0x1f   : > { %2275 = vst [vmem:[#allocation8_spill] sm:$0xff] %v1808_v14  ;;  %316 = vmatprep.subr.bf16.mxu0 %v1798_v9  ;;  %558 = vmatprep.subr.bf16.mxu1 %v1798_v9  ;;  %v201_v21 = vld [vmem:[%s1786_s30] sm:$0xff]  ;;  %v1825_v22 = vpack.c.bf16 %v204_v19, %v202_v18  ;;  %v203_v23 = vld [vmem:[%s1786_s30 + $0x10] sm:$0xff]  ;;  %p1627_p0 = pneg %p1626_p13 }
  0x20   : > { %2276 = vst [vmem:[#allocation9_spill] sm:$0xff] %v1813_v16  ;;  %2277 = vst [vmem:[#allocation10_spill] sm:$0xff] %v1820_v20  ;;  %v1830_v24 = vpack.c.bf16 %v203_v23, %v201_v21  ;;  %p1633_p3 = por %p1632_p2, %p1631_p1 }
  0x21   : > { %2278 = vst [vmem:[#allocation11_spill] sm:$0xff] %v1825_v22 }
  0x22   : > { %317 = vmatpush1.bf16.msra.mxu0 %v1808_v14  ;;  %559 = vmatpush1.bf16.msra.mxu1 %v1808_v14  ;;  %2279 = vst [vmem:[#allocation12_spill] sm:$0xff] %v1830_v24  ;;  %p1634_p5 = pnand %p1633_p3, %p1627_p0 }
  0x23   : > { %318 = vmatprep.subr.bf16.mxu0 %v1813_v16  ;;  %560 = vmatprep.subr.bf16.mxu1 %v1813_v16 }
  0x26   : > { %319 = vmatpush1.bf16.msra.mxu0 %v1820_v20  ;;  %561 = vmatpush1.bf16.msra.mxu1 %v1820_v20 }
  0x27   : > { %320 = vmatprep.subr.bf16.mxu0 %v1825_v22  ;;  %562 = vmatprep.subr.bf16.mxu1 %v1825_v22 }
  0x2a   : > { %321 = vmatpush1.bf16.msra.mxu0 %v1830_v24  ;;  %563 = vmatpush1.bf16.msra.mxu1 %v1830_v24 }
  0x2d   : > { %1473 = vmatmul.mubr.msk.bf16.vlgmr.msra.gmra.mxu0 %vm281_vm0, %v1592_v25  ;;  %1489 = vmatmul.mubr.msk.bf16.vlgmr.msra.gmra.mxu1 %vm281_vm0, %v1593_v26 }
  0x2e   : > { %348 = vmatprep.mubr.bf16.mxu0 %v2252_v0  ;;  %590 = vmatprep.mubr.bf16.mxu1 %v2252_v0 }
  0x35   : > { %1474 = vmatmul.mubr.msk.bf16.gmra.mxu0 %vm281_vm0, %v1594_v27  ;;  %1490 = vmatmul.mubr.msk.bf16.gmra.mxu1 %vm281_vm0, %v1595_v28 }
  0x36   : > { %358 = vmatprep.mubr.bf16.mxu0 %v2252_v0  ;;  %600 = vmatprep.mubr.bf16.mxu1 %v2252_v0 }
  0x3d   : > { %1475 = vmatmul.mubr.msk.bf16.gmra.mxu0 %vm281_vm0, %v1596_v29  ;;  %1491 = vmatmul.mubr.msk.bf16.gmra.mxu1 %vm281_vm0, %v1597_v30 }
  0x3e   : > { %368 = vmatprep.mubr.bf16.mxu0 %v2252_v0  ;;  %610 = vmatprep.mubr.bf16.mxu1 %v2252_v0 }
  0x45   : > { %1476 = vmatmul.mubr.msk.bf16.gmra.mxu0 %vm281_vm0, %v1598_v31  ;;  %1492 = vmatmul.mubr.msk.bf16.gmra.mxu1 %vm281_vm0, %v1599_v32 }
  0x46   : > { %378 = vmatprep.mubr.bf16.mxu0 %v2252_v0  ;;  %620 = vmatprep.mubr.bf16.mxu1 %v2252_v0 }
  0x4d   : > { %1477 = vmatmul.mubr.msk.bf16.gmra.mxu0 %vm281_vm0, %v1600_v33  ;;  %1493 = vmatmul.mubr.msk.bf16.gmra.mxu1 %vm281_vm0, %v1601_v34 }
  0x4e   : > { %388 = vmatprep.mubr.bf16.mxu0 %v2252_v0  ;;  %630 = vmatprep.mubr.bf16.mxu1 %v2252_v0 }
  0x55   : > { %1478 = vmatmul.mubr.msk.bf16.gmra.mxu0 %vm281_vm0, %v1602_v35  ;;  %1494 = vmatmul.mubr.msk.bf16.gmra.mxu1 %vm281_vm0, %v1603_v36 }
  0x56   : > { %398 = vmatprep.mubr.bf16.mxu0 %v2252_v0  ;;  %640 = vmatprep.mubr.bf16.mxu1 %v2252_v0 }
  0x5d   : > { %1479 = vmatmul.mubr.msk.bf16.gmra.mxu0 %vm281_vm0, %v1604_v37  ;;  %1495 = vmatmul.mubr.msk.bf16.gmra.mxu1 %vm281_vm0, %v1605_v38 }
  0x5e   : > { %408 = vmatprep.mubr.bf16.mxu0 %v2252_v0  ;;  %650 = vmatprep.mubr.bf16.mxu1 %v2252_v0 }
  0x65   : > { %1480 = vmatmul.mubr.msk.bf16.gmra.mxu0 %vm281_vm0, %v1606_v39  ;;  %1496 = vmatmul.mubr.msk.bf16.gmra.mxu1 %vm281_vm0, %v1607_v40 }
  0x66   : > { %742 = vmatprep.mubr.bf16.mxu0 %v2252_v0  ;;  %783 = vmatprep.mubr.bf16.mxu1 %v2252_v0 }
  0xed   : > { %v340_v41 = vpop.f32.mrf.mxu0  ;;  %v582_v42 = vpop.f32.mrf.mxu1 }
  0xee   : > { %v419_v45 = vmax.f32 %v340_v41, 0.0  ;;  %v661_v48 = vmax.f32 %v582_v42, 0.0 }
  0xef   : > { %v342_v43 = vpop.f32.mrf.mxu0  ;;  %v584_v44 = vpop.f32.mrf.mxu1 }
  0xf0   : > { %v420_v49 = vmax.f32 %v342_v43, 0.0  ;;  %v662_v52 = vmax.f32 %v584_v44, 0.0 }
  0xf1   : > { %v344_v46 = vpop.f32.mrf.mxu0  ;;  %v586_v47 = vpop.f32.mrf.mxu1 }
  0xf2   : > { %v421_v50 = vmax.f32 %v344_v46, 0.0  ;;  %v663_v51 = vmax.f32 %v586_v47, 0.0 }
  0xf3   : > { %v346_v53 = vpop.f32.mrf.mxu0  ;;  %v588_v54 = vpop.f32.mrf.mxu1 }
  0xf4   : > { %v1916_v55 = vpack.c.bf16 %v421_v50, %v419_v45  ;;  %v1918_v56 = vpack.c.bf16 %v663_v51, %v661_v48  ;;  %v422_v57 = vmax.f32 %v346_v53, 0.0  ;;  %v664_v58 = vmax.f32 %v588_v54, 0.0 }
  0xf5   : > { %v350_v59 = vpop.f32.mrf.mxu0  ;;  %v592_v60 = vpop.f32.mrf.mxu1 }
  0xf6   : > { %2280 = vst [vmem:[#allocation13_spill] sm:$0xff] %v1916_v55  ;;  %2281 = vst [vmem:[#allocation14_spill] sm:$0xff] %v1918_v56  ;;  %v1920_v61 = vpack.c.bf16 %v422_v57, %v420_v49  ;;  %v1922_v62 = vpack.c.bf16 %v664_v58, %v662_v52  ;;  %v423_v2 = vmax.f32 %v350_v59, 0.0  ;;  %v665_v6 = vmax.f32 %v592_v60, 0.0 }
  0xf7   : > { %v352_v63 = vpop.f32.mrf.mxu0  ;;  %v594_v1 = vpop.f32.mrf.mxu1 }
  0xf8   : > { %2282 = vst [vmem:[#allocation15_spill] sm:$0xff] %v1920_v61  ;;  %2283 = vst [vmem:[#allocation16_spill] sm:$0xff] %v1922_v62  ;;  %v424_v7 = vmax.f32 %v352_v63, 0.0  ;;  %v666_v12 = vmax.f32 %v594_v1, 0.0 }
  0xf9   : > { %v354_v3 = vpop.f32.mrf.mxu0  ;;  %v596_v5 = vpop.f32.mrf.mxu1 }
  0xfa   : > { %v425_v10 = vmax.f32 %v354_v3, 0.0  ;;  %v667_v11 = vmax.f32 %v596_v5, 0.0 }
  0xfb   : > { %v356_v13 = vpop.f32.mrf.mxu0  ;;  %v598_v15 = vpop.f32.mrf.mxu1 }
  0xfc   : > { %v1924_v17 = vpack.c.bf16 %v425_v10, %v423_v2  ;;  %v1926_v18 = vpack.c.bf16 %v667_v11, %v665_v6  ;;  %v426_v19 = vmax.f32 %v356_v13, 0.0  ;;  %v668_v21 = vmax.f32 %v598_v15, 0.0 }
  0xfd   : > { %v1928_v23 = vpop.f32.mrf.mxu0  ;;  %v1930_v25 = vpop.f32.mrf.mxu1 }
  0xfe   : > { %2284 = vst [vmem:[#allocation17_spill] sm:$0xff] %v1924_v17  ;;  %2285 = vst [vmem:[#allocation18_spill] sm:$0xff] %v1926_v18  ;;  %v1932_v26 = vpack.c.bf16 %v426_v19, %v424_v7  ;;  %v1934_v27 = vpack.c.bf16 %v668_v21, %v666_v12 }
  0xff   : > { %2286 = vst [vmem:[#allocation19_spill] sm:$0xff] %v1930_v25  ;;  %v1936_v28 = vpop.f32.mrf.mxu0  ;;  %v1938_v29 = vpop.f32.mrf.mxu1 }
 0x100   : > { %2287 = vst [vmem:[#allocation20_spill] sm:$0xff] %v1932_v26  ;;  %2288 = vst [vmem:[#allocation21_spill] sm:$0xff] %v1934_v27 }
 0x101   : > { %v1940_v30 = vpop.f32.mrf.mxu0  ;;  %v1942_v31 = vpop.f32.mrf.mxu1 }
 0x102   : > { %2289 = vst [vmem:[#allocation22_spill] sm:$0xff] %v1942_v31 }
 0x103   : > { %v1944_v32 = vpop.f32.mrf.mxu0  ;;  %v1946_v33 = vpop.f32.mrf.mxu1 }
 0x105   : > { %v1948_v34 = vpop.f32.mrf.mxu0  ;;  %v1950_v35 = vpop.f32.mrf.mxu1 }
 0x107   : > { %v1952_v36 = vpop.f32.mrf.mxu0  ;;  %v1954_v37 = vpop.f32.mrf.mxu1 }
 0x109   : > { %v1956_v38 = vpop.f32.mrf.mxu0  ;;  %v1958_v39 = vpop.f32.mrf.mxu1 }
 0x10b   : > { %v1960_v40 = vpop.f32.mrf.mxu0  ;;  %v1962_v41 = vpop.f32.mrf.mxu1 }
 0x10d   : > { %v1964_v42 = vpop.f32.mrf.mxu0  ;;  %v1966_v43 = vpop.f32.mrf.mxu1 }
 0x10f   : > { %v1968_v44 = vpop.f32.mrf.mxu0  ;;  %v1970_v45 = vpop.f32.mrf.mxu1 }
 0x111   : > { %v1972_v46 = vpop.f32.mrf.mxu0  ;;  %v1974_v47 = vpop.f32.mrf.mxu1 }
 0x113   : > { %v1976_v48 = vpop.f32.mrf.mxu0  ;;  %v1978_v49 = vpop.f32.mrf.mxu1 }
 0x115   : > { %v1980_v50 = vpop.f32.mrf.mxu0  ;;  %v1982_v51 = vpop.f32.mrf.mxu1 }
 0x117   : > { %v392_v52 = vpop.f32.mrf.mxu0  ;;  %v1984_v53 = vpop.f32.mrf.mxu1 }
 0x118   : > { %v440_v16 = vmax.f32 %v392_v52, 0.0 }
 0x119   : > { %v1986_v54 = vpop.f32.mrf.mxu0  ;;  %v1988_v57 = vpop.f32.mrf.mxu1 }
 0x11b   : > { %v396_v58 = vpop.f32.mrf.mxu0  ;;  %v638_v59 = vpop.f32.mrf.mxu1 }
 0x11c   : > { %v442_v14 = vmax.f32 %v396_v58, 0.0  ;;  %v439_v58 = vmax.f32 %v1980_v50, 0.0  ;;  %v677_v50 = vmax.f32 %v1966_v43, 0.0  ;;  %v427_v43 = vmax.f32 %v1928_v23, 0.0 }
 0x11d   : > { %v400_v60 = vpop.f32.mrf.mxu0  ;;  %v642_v63 = vpop.f32.mrf.mxu1 }
 0x11e   : > { %v443_v17 = vmax.f32 %v400_v60, 0.0 }
 0x11f   : > { %v402_v1 = vpop.f32.mrf.mxu0  ;;  %v644_v2 = vpop.f32.mrf.mxu1 }
 0x120   : > { %v444_v0 = vmax.f32 %v402_v1, 0.0 }
 0x121   : > { %v404_v3 = vpop.f32.mrf.mxu0  ;;  %v646_v5 = vpop.f32.mrf.mxu1 }
 0x122   : > { %v445_v18 = vmax.f32 %v404_v3, 0.0 }
 0x123   : > { %v406_v6 = vpop.f32.mrf.mxu0  ;;  %v648_v7 = vpop.f32.mrf.mxu1 }
 0x124   : > { %v446_v24 = vmax.f32 %v406_v6, 0.0  ;;  %v688_v55 = vmax.f32 %v648_v7, 0.0  ;;  %v687_v6 = vmax.f32 %v646_v5, 0.0  ;;  %v441_v7 = vmax.f32 %v1986_v54, 0.0  ;;  %v2295_v5 = vld [vmem:[#allocation17_spill] sm:$0xff] }
 0x125   : > { %v410_v10 = vpop.f32.mrf.mxu0  ;;  %v652_v11 = vpop.f32.mrf.mxu1  ;;  %v429_v54 = vmax.f32 %v1940_v30, 0.0  ;;  %v2292_v30 = vld [vmem:[#allocation21_spill] sm:$0xff] }
 0x126   : > { %v447_v15 = vmax.f32 %v410_v10, 0.0  ;;  %v689_v26 = vmax.f32 %v652_v11, 0.0  ;;  %v686_v10 = vmax.f32 %v644_v2, 0.0  ;;  %v464_v25 = vpack.c.bf16 %v446_v24, %v444_v0  ;;  %v2296_v11 = vld [vmem:[#allocation16_spill] sm:$0xff] }
 0x127   : > { %v412_v12 = vpop.f32.mrf.mxu0  ;;  %v654_v13 = vpop.f32.mrf.mxu1  ;;  %v438_v0 = vmax.f32 %v1976_v48, 0.0  ;;  %v462_v24 = vpack.c.bf16 %v442_v14, %v440_v16  ;;  %v434_v14 = vmax.f32 %v1960_v40, 0.0  ;;  %v678_v16 = vmax.f32 %v1970_v45, 0.0 }
 0x128   : > { %v448_v22 = vmax.f32 %v412_v12, 0.0  ;;  %v690_v56 = vmax.f32 %v654_v13, 0.0  ;;  %v706_v52 = vpack.c.bf16 %v688_v55, %v686_v10  ;;  %v431_v48 = vmax.f32 %v1948_v34, 0.0  ;;  %v2297_v13 = vld [vmem:[#allocation15_spill] sm:$0xff]  ;;  %v709_v10 = vld [vmem:[%s2250_s2 + $0x4] sm:$0xf] }
 0x129   : > { %v414_v19 = vpop.f32.mrf.mxu0  ;;  %v656_v21 = vpop.f32.mrf.mxu1  ;;  %v428_v40 = vmax.f32 %v1936_v28, 0.0  ;;  %v430_v45 = vmax.f32 %v1944_v32, 0.0  ;;  %v672_v34 = vmax.f32 %v1946_v33, 0.0  ;;  %v670_v32 = vmax.f32 %v1938_v29, 0.0  ;;  %v2291_v33 = vld [vmem:[#allocation19_spill] sm:$0xff]  ;;  %v2293_v29 = vld [vmem:[#allocation20_spill] sm:$0xff] }
 0x12a   : > { %v449_v20 = vmax.f32 %v414_v19, 0.0  ;;  %v691_v9 = vmax.f32 %v656_v21, 0.0  ;;  %v684_v19 = vmax.f32 %v638_v59, 0.0  ;;  %v2290_v59 = vld [vmem:[#allocation22_spill] sm:$0xff]  ;;  %v669_v2 = vmax.f32 %v2291_v33, 0.0  ;;  %v2299_v21 = vld [vmem:[#allocation13_spill] sm:$0xff] }
 0x12b   : > { %v416_v8 = vpop.f32.mrf.mxu0  ;;  %v658_v4 = vpop.f32.mrf.mxu1  ;;  %v455_v3 = vpack.c.bf16 %v429_v54, %v427_v43 }
 0x12c   : > { %v450_v61 = vmax.f32 %v416_v8, 0.0  ;;  %v692_v62 = vmax.f32 %v658_v4, 0.0  ;;  %v465_v27 = vpack.c.bf16 %v449_v20, %v447_v15  ;;  %v707_v12 = vpack.c.bf16 %v691_v9, %v689_v26  ;;  %v2298_v15 = vld [vmem:[#allocation14_spill] sm:$0xff] }
 0x12d   : > { %v685_v8 = vmax.f32 %v642_v63, 0.0  ;;  %v463_v4 = vpack.c.bf16 %v445_v18, %v443_v17  ;;  %v436_v20 = vmax.f32 %v1968_v44, 0.0  ;;  %v683_v9 = vmax.f32 %v1988_v57, 0.0 }
 0x12e   : > { %v466_v31 = vpack.c.bf16 %v450_v61, %v448_v22  ;;  %v708_v1 = vpack.c.bf16 %v692_v62, %v690_v56  ;;  %v682_v22 = vmax.f32 %v1984_v53, 0.0  ;;  %v680_v56 = vmax.f32 %v1978_v49, 0.0 }
 0x12f   : > { %v705_v55 = vpack.c.bf16 %v687_v6, %v685_v8  ;;  %v435_v62 = vmax.f32 %v1964_v42, 0.0  ;;  %v437_v17 = vmax.f32 %v1972_v46, 0.0  ;;  %v681_v18 = vmax.f32 %v1982_v51, 0.0  ;;  %v2300_v6 = vld [vmem:[#allocation5_spill] sm:$0xff]  ;;  %v2306_v8 = vld [vmem:[#allocation10_spill] sm:$0xff] }
 0x130   : > { %710 = vmatprep.subr.bf16.mxu0 %v708_v1  ;;  %751 = vmatprep.subr.bf16.mxu1 %v466_v31  ;;  %v704_v61 = vpack.c.bf16 %v684_v19, %v682_v22  ;;  %v461_v26 = vpack.c.bf16 %v441_v7, %v439_v58  ;;  %v679_v31 = vmax.f32 %v1974_v47, 0.0  ;;  %v676_v42 = vmax.f32 %v1962_v41, 0.0  ;;  %v467_v1 = vld [vmem:[%s2250_s2] sm:$0xf]  ;;  %v2304_v58 = vld [vmem:[#allocation8_spill] sm:$0xff]  ;;  %v1609_v22 = vld [vmem:[%s2249_s1 + $0x88] sm:$0xff]  }
 0x131   : > { %711 = vmatpush1.bf16.msra.mxu0 %v707_v12  ;;  %752 = vmatpush1.bf16.msra.mxu1 %v465_v27  ;;  %v432_v27 = vmax.f32 %v1952_v36, 0.0  ;;  %v703_v44 = vpack.c.bf16 %v683_v9, %v681_v18  ;;  %v702_v46 = vpack.c.bf16 %v680_v56, %v678_v16  ;;  %v433_v49 = vmax.f32 %v1956_v38, 0.0  ;;  %v2301_v12 = vld [vmem:[#allocation6_spill] sm:$0xff]  ;;  %v2305_v7 = vld [vmem:[#allocation9_spill] sm:$0xff]  ;;  %v1611_v9 = vld [vmem:[%s2249_s1 + $0x98] sm:$0xff]  }
 0x132   : > { %712 = vmatprep.subr.bf16.mxu0 %v706_v52  ;;  %753 = vmatprep.subr.bf16.mxu1 %v464_v25  ;;  %v460_v25 = vpack.c.bf16 %v438_v0, %v436_v20  ;;  %v459_v36 = vpack.c.bf16 %v437_v17, %v435_v62  ;;  %v674_v51 = vmax.f32 %v1954_v37, 0.0  ;;  %v675_v41 = vmax.f32 %v1958_v39, 0.0  ;;  %v2303_v52 = vld [vmem:[#allocation7_spill] sm:$0xff]  ;;  %v1608_v20 = vld [vmem:[%s2249_s1 + $0x80] sm:$0xff]   ;;  %v2308_v0 = vld [vmem:[#allocation12_spill] sm:$0xff] }
 0x133   : > { %v458_v47 = vpack.c.bf16 %v434_v14, %v432_v27  ;;  %v701_v53 = vpack.c.bf16 %v679_v31, %v677_v50  ;;  %v673_v57 = vmax.f32 %v1950_v35, 0.0  ;;  %v457_v28 = vpack.c.bf16 %v433_v49, %v431_v48  ;;  %v2294_v35 = vld [vmem:[#allocation18_spill] sm:$0xff]  ;;  %v1615_v62 = vld [vmem:[%s2249_s1 + $0xb8] sm:$0xff]  }
 0x134   : > { %v700_v38 = vpack.c.bf16 %v676_v42, %v674_v51  ;;  %v456_v37 = vpack.c.bf16 %v430_v45, %v428_v40  ;;  %v671_v39 = vmax.f32 %v2290_v59, 0.0  ;;  %v698_v63 = vpack.c.bf16 %v672_v34, %v670_v32  ;;  %v1613_v56 = vld [vmem:[%s2249_s1 + $0xa8] sm:$0xff]  }
 0x135   : > { %713 = vmatpush1.bf16.msra.mxu0 %v705_v55  ;;  %754 = vmatpush1.bf16.msra.mxu1 %v463_v4  ;;  %v699_v60 = vpack.c.bf16 %v675_v41, %v673_v57  ;;  %v2302_v19 = vmov 0   ;;  %v2307_v4 = vld [vmem:[#allocation11_spill] sm:$0xff]  ;;  %v1612_v55 = vld [vmem:[%s2249_s1 + $0xa0] sm:$0xff]  }
 0x136   : > { %714 = vmatprep.subr.bf16.mxu0 %v704_v61  ;;  %755 = vmatprep.subr.bf16.mxu1 %v462_v24  ;;  %v697_v23 = vpack.c.bf16 %v671_v39, %v669_v2  ;;  %v1610_v24 = vld [vmem:[%s2249_s1 + $0x90] sm:$0xff]  }
 0x137   : > { %v1614_v61 = vld [vmem:[%s2249_s1 + $0xb0] sm:$0xff]  }
 0x139   : > { %715 = vmatpush1.bf16.msra.mxu0 %v703_v44  ;;  %756 = vmatpush1.bf16.msra.mxu1 %v461_v26 }
 0x13a   : > { %716 = vmatprep.subr.bf16.mxu0 %v702_v46  ;;  %757 = vmatprep.subr.bf16.mxu1 %v460_v25 }
 0x13d   : > { %717 = vmatpush1.bf16.msra.mxu0 %v701_v53  ;;  %758 = vmatpush1.bf16.msra.mxu1 %v459_v36 }
 0x13e   : > { %718 = vmatprep.subr.bf16.mxu0 %v700_v38  ;;  %759 = vmatprep.subr.bf16.mxu1 %v458_v47 }
 0x141   : > { %719 = vmatpush1.bf16.msra.mxu0 %v699_v60  ;;  %760 = vmatpush1.bf16.msra.mxu1 %v457_v28 }
 0x142   : > { %720 = vmatprep.subr.bf16.mxu0 %v698_v63  ;;  %761 = vmatprep.subr.bf16.mxu1 %v456_v37 }
 0x145   : > { %721 = vmatpush1.bf16.msra.mxu0 %v697_v23  ;;  %762 = vmatpush1.bf16.msra.mxu1 %v455_v3 }
 0x146   : > { %722 = vmatprep.subr.bf16.mxu0 %v2292_v30  ;;  %763 = vmatprep.subr.bf16.mxu1 %v2293_v29 }
 0x149   : > { %723 = vmatpush1.bf16.msra.mxu0 %v2294_v35  ;;  %764 = vmatpush1.bf16.msra.mxu1 %v2295_v5 }
 0x14a   : > { %724 = vmatprep.subr.bf16.mxu0 %v2296_v11  ;;  %765 = vmatprep.subr.bf16.mxu1 %v2297_v13 }
 0x14d   : > { %725 = vmatpush1.bf16.msra.mxu0 %v2298_v15  ;;  %766 = vmatpush1.bf16.msra.mxu1 %v2299_v21 }
 0x14e   : > { %880 = vmatprep.subr.bf16.mxu0 %v2300_v6 }
 0x150   : > { %743 = vmatmul.mubr.bf16.vlgmr.msra.gmra.mxu0 %v709_v10  ;;  %784 = vmatmul.mubr.bf16.vlgmr.msra.gmra.mxu1 %v467_v1 }
 0x151   : > { %881 = vmatpush1.bf16.msra.mxu0 %v2301_v12  ;;  %904 = vmatprep.mubr.bf16.mxu0 %v2302_v19 }
 0x152   : > { %882 = vmatprep.subr.bf16.mxu0 %v2303_v52  ;;  %1066 = vmatprep.mubr.bf16.mxu1 %v2302_v19 }
 0x155   : > { %883 = vmatpush1.bf16.msra.mxu0 %v2304_v58 }
 0x156   : > { %884 = vmatprep.subr.bf16.mxu0 %v2305_v7 }
 0x159   : > { %885 = vmatpush1.bf16.msra.mxu0 %v2306_v8 }
 0x15a   : > { %886 = vmatprep.subr.bf16.mxu0 %v2307_v4 }
 0x15d   : > { %887 = vmatpush1.bf16.msra.mxu0 %v2308_v0 }
 0x160   : > { %1505 = vmatmul.mubr.msk.bf16.vlgmr.msra.gmra.mxu0 %vm281_vm0, %v1608_v20 }
 0x161   : > { %914 = vmatprep.mubr.bf16.mxu0 %v2302_v19 }
 0x168   : > { %1506 = vmatmul.mubr.msk.bf16.gmra.mxu0 %vm281_vm0, %v1609_v22 }
 0x169   : > { %924 = vmatprep.mubr.bf16.mxu0 %v2302_v19 }
 0x170   : > { %1507 = vmatmul.mubr.msk.bf16.gmra.mxu0 %vm281_vm0, %v1610_v24 }
 0x171   : > { %934 = vmatprep.mubr.bf16.mxu0 %v2302_v19 }
 0x178   : > { %1508 = vmatmul.mubr.msk.bf16.gmra.mxu0 %vm281_vm0, %v1611_v9 }
 0x179   : > { %944 = vmatprep.mubr.bf16.mxu0 %v2302_v19 }
 0x180   : > { %1509 = vmatmul.mubr.msk.bf16.gmra.mxu0 %vm281_vm0, %v1612_v55 }
 0x181   : > { %954 = vmatprep.mubr.bf16.mxu0 %v2302_v19 }
 0x188   : > { %1510 = vmatmul.mubr.msk.bf16.gmra.mxu0 %vm281_vm0, %v1613_v56 }
 0x189   : > { %964 = vmatprep.mubr.bf16.mxu0 %v2302_v19 }
 0x190   : > { %1511 = vmatmul.mubr.msk.bf16.gmra.mxu0 %vm281_vm0, %v1614_v61 }
 0x191   : > { %974 = vmatprep.mubr.bf16.mxu0 %v2302_v19 }
 0x198   : > { %1512 = vmatmul.mubr.msk.bf16.gmra.mxu0 %vm281_vm0, %v1615_v62 }
 0x199   : > { %1351 = vmatprep.mubr.bf16.mxu0 %v2302_v19 }
 0x210   : > { %v744_v17 = vpop.f32.mrf.mxu0  ;;  %v785_v18 = vpop.f32.mrf.mxu1 }
 0x211   : > { %v2083_v26 = vadd.f32 %v785_v18, %v744_v17 }
 0x212   : > { %v746_v27 = vpop.f32.mrf.mxu0  ;;  %v787_v14 = vpop.f32.mrf.mxu1 }
 0x213   : > { %v2085_v16 = vadd.f32 %v787_v14, %v746_v27 }
 0x214   : > { %v748_v25 = vpop.f32.mrf.mxu0  ;;  %v789_v31 = vpop.f32.mrf.mxu1 }
 0x216   : > { %v749_v44 = vpop.f32.mrf.mxu0  ;;  %v790_v42 = vpop.f32.mrf.mxu1 }
 0x220   : > { %v906_v46 = vpop.f32.mrf.mxu0 }
 0x221   : > { %v985_v50 = vmax.f32 %v906_v46, 0.0 }
 0x222   : > { %v908_v48 = vpop.f32.mrf.mxu0 }
 0x223   : > { %v986_v45 = vmax.f32 %v908_v48, 0.0 }
 0x224   : > { %v910_v49 = vpop.f32.mrf.mxu0 }
 0x225   : > { %v987_v36 = vmax.f32 %v910_v49, 0.0 }
 0x226   : > { %v912_v40 = vpop.f32.mrf.mxu0 }
 0x227   : > { %v2087_v51 = vpack.c.bf16 %v987_v36, %v985_v50  ;;  %v988_v47 = vmax.f32 %v912_v40, 0.0 }
 0x228   : > { %v916_v41 = vpop.f32.mrf.mxu0 }
 0x229   : > { %v2089_v53 = vpack.c.bf16 %v988_v47, %v986_v45  ;;  %v989_v43 = vmax.f32 %v916_v41, 0.0 }
 0x22a   : > { %v918_v34 = vpop.f32.mrf.mxu0 }
 0x22b   : > { %v990_v28 = vmax.f32 %v918_v34, 0.0 }
 0x22c   : > { %v920_v38 = vpop.f32.mrf.mxu0 }
 0x22d   : > { %v991_v54 = vmax.f32 %v920_v38, 0.0 }
 0x22e   : > { %v922_v57 = vpop.f32.mrf.mxu0 }
 0x22f   : > { %v2091_v32 = vpack.c.bf16 %v991_v54, %v989_v43  ;;  %v992_v37 = vmax.f32 %v922_v57, 0.0 }
 0x230   : > { %v2093_v59 = vpop.f32.mrf.mxu0 }
 0x231   : > { %v2095_v39 = vpack.c.bf16 %v992_v37, %v990_v28 }
 0x232   : > { %v2097_v60 = vpop.f32.mrf.mxu0 }
 0x234   : > { %v2099_v63 = vpop.f32.mrf.mxu0 }
 0x236   : > { %v2101_v33 = vpop.f32.mrf.mxu0 }
 0x238   : > { %v936_v2 = vpop.f32.mrf.mxu0 }
 0x23a   : > { %v938_v3 = vpop.f32.mrf.mxu0 }
 0x23b   : > { %v998_v37 = vmax.f32 %v938_v3, 0.0 }
 0x23c   : > { %v940_v23 = vpop.f32.mrf.mxu0 }
 0x23e   : > { %v942_v30 = vpop.f32.mrf.mxu0 }
 0x23f   : > { %v1000_v54 = vmax.f32 %v942_v30, 0.0  ;;  %v993_v30 = vmax.f32 %v2093_v59, 0.0 }
 0x240   : > { %v946_v29 = vpop.f32.mrf.mxu0 }
 0x241   : > { %v1001_v28 = vmax.f32 %v946_v29, 0.0 }
 0x242   : > { %v948_v35 = vpop.f32.mrf.mxu0 }
 0x243   : > { %v1002_v34 = vmax.f32 %v948_v35, 0.0  ;;  %v995_v35 = vmax.f32 %v2099_v63, 0.0 }
 0x244   : > { %v950_v5 = vpop.f32.mrf.mxu0 }
 0x245   : > { %v1003_v38 = vmax.f32 %v950_v5, 0.0  ;;  %v1021_v3 = vpack.c.bf16 %v995_v35, %v993_v30 }
 0x246   : > { %v952_v11 = vpop.f32.mrf.mxu0 }
 0x247   : > { %v1004_v45 = vmax.f32 %v952_v11, 0.0  ;;  %v994_v11 = vmax.f32 %v2097_v60, 0.0  ;;  %v1033_v60 = vld [vmem:[%s2250_s2 + $0x8] sm:$0xf] }
 0x248   : > { %v956_v13 = vpop.f32.mrf.mxu0 }
 0x249   : > { %v1005_v41 = vmax.f32 %v956_v13, 0.0  ;;  %v1026_v57 = vpack.c.bf16 %v1004_v45, %v1002_v34 }
 0x24a   : > { %v958_v15 = vpop.f32.mrf.mxu0 }
 0x24b   : > { %v1006_v50 = vmax.f32 %v958_v15, 0.0  ;;  %v996_v15 = vmax.f32 %v2101_v33, 0.0 }
 0x24c   : > { %v960_v21 = vpop.f32.mrf.mxu0 }
 0x24d   : > { %v1007_v36 = vmax.f32 %v960_v21, 0.0  ;;  %v1024_v21 = vpack.c.bf16 %v1000_v54, %v998_v37  ;;  %v1022_v13 = vpack.c.bf16 %v996_v15, %v994_v11 }
 0x24e   : > { %v962_v10 = vpop.f32.mrf.mxu0 }
 0x24f   : > { %v1008_v46 = vmax.f32 %v962_v10, 0.0  ;;  %v1027_v43 = vpack.c.bf16 %v1007_v36, %v1005_v41  ;;  %v999_v10 = vmax.f32 %v940_v23, 0.0 }
 0x250   : > { %v966_v1 = vpop.f32.mrf.mxu0 }
 0x251   : > { %v1009_v49 = vmax.f32 %v966_v1, 0.0  ;;  %v1028_v47 = vpack.c.bf16 %v1008_v46, %v1006_v50  ;;  %v1025_v1 = vpack.c.bf16 %v1003_v38, %v1001_v28 }
 0x252   : > { %v968_v20 = vpop.f32.mrf.mxu0 }
 0x253   : > { %v1010_v25 = vmax.f32 %v968_v20, 0.0  ;;  %v997_v20 = vmax.f32 %v936_v2, 0.0 }
 0x254   : > { %v970_v22 = vpop.f32.mrf.mxu0 }
 0x255   : > { %v1011_v44 = vmax.f32 %v970_v22, 0.0  ;;  %v1023_v5 = vpack.c.bf16 %v999_v10, %v997_v20 }
 0x256   : > { %v972_v24 = vpop.f32.mrf.mxu0 }
 0x257   : > { %v1012_v17 = vmax.f32 %v972_v24, 0.0  ;;  %v1029_v40 = vpack.c.bf16 %v1011_v44, %v1009_v49 }
 0x258   : > { %v976_v9 = vpop.f32.mrf.mxu0 }
 0x259   : > { %v1013_v14 = vmax.f32 %v976_v9, 0.0  ;;  %v1030_v48 = vpack.c.bf16 %v1012_v17, %v1010_v25 }
 0x25a   : > { %v978_v55 = vpop.f32.mrf.mxu0 }
 0x25b   : > { %v1014_v18 = vmax.f32 %v978_v55, 0.0 }
 0x25c   : > { %v980_v56 = vpop.f32.mrf.mxu0 }
 0x25d   : > { %v1015_v61 = vmax.f32 %v980_v56, 0.0 }
 0x25e   : > { %v982_v62 = vpop.f32.mrf.mxu0 }
 0x25f   : > { %v1016_v27 = vmax.f32 %v982_v62, 0.0  ;;  %v1031_v42 = vpack.c.bf16 %v1015_v61, %v1013_v14 }
 0x261   : > { %v1032_v31 = vpack.c.bf16 %v1016_v27, %v1014_v18 }
 0x263   : > { %1034 = vmatprep.subr.bf16.mxu1 %v1032_v31 }
 0x264   : > { %1035 = vmatpush1.bf16.msra.mxu1 %v1031_v42 }
 0x265   : > { %1036 = vmatprep.subr.bf16.mxu1 %v1030_v48 }
 0x268   : > { %1037 = vmatpush1.bf16.msra.mxu1 %v1029_v40 }
 0x269   : > { %1038 = vmatprep.subr.bf16.mxu1 %v1028_v47 }
 0x26c   : > { %1039 = vmatpush1.bf16.msra.mxu1 %v1027_v43 }
 0x26d   : > { %1040 = vmatprep.subr.bf16.mxu1 %v1026_v57 }
 0x270   : > { %1041 = vmatpush1.bf16.msra.mxu1 %v1025_v1 }
 0x271   : > { %1042 = vmatprep.subr.bf16.mxu1 %v1024_v21 }
 0x274   : > { %1043 = vmatpush1.bf16.msra.mxu1 %v1023_v5 }
 0x275   : > { %1044 = vmatprep.subr.bf16.mxu1 %v1022_v13 }
 0x278   : > { %1045 = vmatpush1.bf16.msra.mxu1 %v1021_v3 }
 0x279   : > { %1046 = vmatprep.subr.bf16.mxu1 %v2095_v39 }
 0x27c   : > { %1047 = vmatpush1.bf16.msra.mxu1 %v2091_v32 }
 0x27d   : > { %1048 = vmatprep.subr.bf16.mxu1 %v2089_v53 }
 0x280   : > { %1049 = vmatpush1.bf16.msra.mxu1 %v2087_v51  ;;  %v1616_v51 = vld [vmem:[%s2249_s1 + $0xc0] sm:$0xff]  }
 0x281   : > { %1165 = vmatprep.subr.bf16.mxu1 %v2300_v6  ;;  %v1617_v6 = vld [vmem:[%s2249_s1 + $0xc8] sm:$0xff]  }
 0x283   : > { %1067 = vmatmul.mubr.bf16.vlgmr.msra.gmra.mxu1 %v1033_v60 }
 0x284   : > { %1166 = vmatpush1.bf16.msra.mxu1 %v2301_v12  ;;  %1189 = vmatprep.mubr.bf16.mxu1 %v2302_v19  ;;  %v1618_v12 = vld [vmem:[%s2249_s1 + $0xd0] sm:$0xff]  }
 0x285   : > { %1167 = vmatprep.subr.bf16.mxu1 %v2303_v52  ;;  %v1619_v52 = vld [vmem:[%s2249_s1 + $0xd8] sm:$0xff]  }
 0x288   : > { %1168 = vmatpush1.bf16.msra.mxu1 %v2304_v58  ;;  %v1620_v58 = vld [vmem:[%s2249_s1 + $0xe0] sm:$0xff]  }
 0x289   : > { %1169 = vmatprep.subr.bf16.mxu1 %v2305_v7  ;;  %v1621_v7 = vld [vmem:[%s2249_s1 + $0xe8] sm:$0xff]  }
 0x28c   : > { %1170 = vmatpush1.bf16.msra.mxu1 %v2306_v8  ;;  %v1622_v8 = vld [vmem:[%s2249_s1 + $0xf0] sm:$0xff]  }
 0x28d   : > { %1171 = vmatprep.subr.bf16.mxu1 %v2307_v4  ;;  %v1623_v4 = vld [vmem:[%s2249_s1 + $0xf8] sm:$0xff]  }
 0x290   : > { %1172 = vmatpush1.bf16.msra.mxu1 %v2308_v0 }
 0x293   : > { %1521 = vmatmul.mubr.msk.bf16.vlgmr.msra.gmra.mxu1 %vm281_vm0, %v1616_v51 }
 0x294   : > { %1199 = vmatprep.mubr.bf16.mxu1 %v2302_v19 }
 0x29b   : > { %1522 = vmatmul.mubr.msk.bf16.gmra.mxu1 %vm281_vm0, %v1617_v6 }
 0x29c   : > { %1209 = vmatprep.mubr.bf16.mxu1 %v2302_v19 }
 0x2a3   : > { %1523 = vmatmul.mubr.msk.bf16.gmra.mxu1 %vm281_vm0, %v1618_v12 }
 0x2a4   : > { %1219 = vmatprep.mubr.bf16.mxu1 %v2302_v19 }
 0x2ab   : > { %1524 = vmatmul.mubr.msk.bf16.gmra.mxu1 %vm281_vm0, %v1619_v52 }
 0x2ac   : > { %1229 = vmatprep.mubr.bf16.mxu1 %v2302_v19 }
 0x2b3   : > { %1525 = vmatmul.mubr.msk.bf16.gmra.mxu1 %vm281_vm0, %v1620_v58 }
 0x2b4   : > { %1239 = vmatprep.mubr.bf16.mxu1 %v2302_v19 }
 0x2bb   : > { %1526 = vmatmul.mubr.msk.bf16.gmra.mxu1 %vm281_vm0, %v1621_v7 }
 0x2bc   : > { %1249 = vmatprep.mubr.bf16.mxu1 %v2302_v19 }
 0x2c3   : > { %1527 = vmatmul.mubr.msk.bf16.gmra.mxu1 %vm281_vm0, %v1622_v8 }
 0x2c4   : > { %1259 = vmatprep.mubr.bf16.mxu1 %v2302_v19 }
 0x2cb   : > { %1528 = vmatmul.mubr.msk.bf16.gmra.mxu1 %vm281_vm0, %v1623_v4 }
 0x343   : > { %v1068_v0 = vpop.f32.mrf.mxu1 }
 0x344   : > { %v2163_v53 = vadd.f32 %v1068_v0, %v2083_v26 }
 0x345   : > { %v1070_v32 = vpop.f32.mrf.mxu1 }
 0x346   : > { %v2166_v59 = vadd.f32 %v1070_v32, %v2085_v16 }
 0x347   : > { %v1072_v39 = vpop.f32.mrf.mxu1 }
 0x349   : > { %v1073_v63 = vpop.f32.mrf.mxu1 }
 0x353   : > { %v1191_v33 = vpop.f32.mrf.mxu1 }
 0x354   : > { %v1270_v19 = vmax.f32 %v1191_v33, 0.0 }
 0x355   : > { %v1193_v2 = vpop.f32.mrf.mxu1 }
 0x356   : > { %v1271_v24 = vmax.f32 %v1193_v2, 0.0 }
 0x357   : > { %v1195_v23 = vpop.f32.mrf.mxu1 }
 0x358   : > { %v1272_v29 = vmax.f32 %v1195_v23, 0.0 }
 0x359   : > { %v1197_v22 = vpop.f32.mrf.mxu1 }
 0x35a   : > { %v2168_v9 = vpack.c.bf16 %v1272_v29, %v1270_v19  ;;  %v1273_v55 = vmax.f32 %v1197_v22, 0.0 }
 0x35b   : > { %v1201_v56 = vpop.f32.mrf.mxu1 }
 0x35c   : > { %v2170_v61 = vpack.c.bf16 %v1273_v55, %v1271_v24  ;;  %v1274_v17 = vmax.f32 %v1201_v56, 0.0 }
 0x35d   : > { %v1203_v26 = vpop.f32.mrf.mxu1 }
 0x35e   : > { %v1275_v27 = vmax.f32 %v1203_v26, 0.0 }
 0x35f   : > { %v1205_v62 = vpop.f32.mrf.mxu1 }
 0x360   : > { %v1276_v16 = vmax.f32 %v1205_v62, 0.0 }
 0x361   : > { %v1207_v18 = vpop.f32.mrf.mxu1 }
 0x362   : > { %v2172_v14 = vpack.c.bf16 %v1276_v16, %v1274_v17  ;;  %v1277_v25 = vmax.f32 %v1207_v18, 0.0 }
 0x363   : > { %v2174_v31 = vpop.f32.mrf.mxu1 }
 0x364   : > { %v2176_v44 = vpack.c.bf16 %v1277_v25, %v1275_v27 }
 0x365   : > { %v2178_v42 = vpop.f32.mrf.mxu1 }
 0x366   : > { %v1279_v16 = vmax.f32 %v2178_v42, 0.0  ;;  %v1318_v42 = vld [vmem:[%s2250_s2 + $0xc] sm:$0xf] }
 0x367   : > { %v2180_v46 = vpop.f32.mrf.mxu1 }
 0x368   : > { %v1280_v18 = vmax.f32 %v2180_v46, 0.0 }
 0x369   : > { %v2182_v48 = vpop.f32.mrf.mxu1 }
 0x36a   : > { %v1281_v26 = vmax.f32 %v2182_v48, 0.0 }
 0x36b   : > { %v1221_v49 = vpop.f32.mrf.mxu1 }
 0x36c   : > { %v1282_v17 = vmax.f32 %v1221_v49, 0.0  ;;  %v1307_v25 = vpack.c.bf16 %v1281_v26, %v1279_v16 }
 0x36d   : > { %v1223_v50 = vpop.f32.mrf.mxu1 }
 0x36e   : > { %v1283_v24 = vmax.f32 %v1223_v50, 0.0 }
 0x36f   : > { %v1225_v36 = vpop.f32.mrf.mxu1 }
 0x370   : > { %v1284_v55 = vmax.f32 %v1225_v36, 0.0 }
 0x371   : > { %v1227_v40 = vpop.f32.mrf.mxu1 }
 0x372   : > { %v1285_v19 = vmax.f32 %v1227_v40, 0.0  ;;  %v1308_v27 = vpack.c.bf16 %v1284_v55, %v1282_v17  ;;  %v1278_v40 = vmax.f32 %v2174_v31, 0.0 }
 0x373   : > { %v1231_v45 = vpop.f32.mrf.mxu1 }
 0x374   : > { %v1286_v22 = vmax.f32 %v1231_v45, 0.0  ;;  %v1309_v62 = vpack.c.bf16 %v1285_v19, %v1283_v24  ;;  %v1306_v50 = vpack.c.bf16 %v1280_v18, %v1278_v40 }
 0x375   : > { %v1233_v47 = vpop.f32.mrf.mxu1 }
 0x376   : > { %v1287_v33 = vmax.f32 %v1233_v47, 0.0 }
 0x377   : > { %v1235_v41 = vpop.f32.mrf.mxu1 }
 0x378   : > { %v1288_v2 = vmax.f32 %v1235_v41, 0.0 }
 0x379   : > { %v1237_v34 = vpop.f32.mrf.mxu1 }
 0x37a   : > { %v1289_v32 = vmax.f32 %v1237_v34, 0.0  ;;  %v1310_v56 = vpack.c.bf16 %v1288_v2, %v1286_v22 }
 0x37b   : > { %v1241_v38 = vpop.f32.mrf.mxu1 }
 0x37c   : > { %v1290_v63 = vmax.f32 %v1241_v38, 0.0  ;;  %v1311_v29 = vpack.c.bf16 %v1289_v32, %v1287_v33 }
 0x37d   : > { %v1243_v43 = vpop.f32.mrf.mxu1 }
 0x37e   : > { %v1291_v8 = vmax.f32 %v1243_v43, 0.0 }
 0x37f   : > { %v1245_v54 = vpop.f32.mrf.mxu1 }
 0x380   : > { %v1292_v4 = vmax.f32 %v1245_v54, 0.0 }
 0x381   : > { %v1247_v57 = vpop.f32.mrf.mxu1 }
 0x382   : > { %v1293_v52 = vmax.f32 %v1247_v57, 0.0  ;;  %v1312_v23 = vpack.c.bf16 %v1292_v4, %v1290_v63 }
 0x383   : > { %v1251_v28 = vpop.f32.mrf.mxu1 }
 0x384   : > { %v1294_v7 = vmax.f32 %v1251_v28, 0.0  ;;  %v1313_v39 = vpack.c.bf16 %v1293_v52, %v1291_v8 }
 0x385   : > { %v1253_v37 = vpop.f32.mrf.mxu1 }
 0x386   : > { %v1295_v60 = vmax.f32 %v1253_v37, 0.0 }
 0x387   : > { %v1255_v10 = vpop.f32.mrf.mxu1 }
 0x388   : > { %v1296_v6 = vmax.f32 %v1255_v10, 0.0 }
 0x389   : > { %v1257_v1 = vpop.f32.mrf.mxu1 }
 0x38a   : > { %v1297_v5 = vmax.f32 %v1257_v1, 0.0  ;;  %v1314_v0 = vpack.c.bf16 %v1296_v6, %v1294_v7 }
 0x38b   : > { %v1261_v15 = vpop.f32.mrf.mxu1 }
 0x38c   : > { %v1298_v3 = vmax.f32 %v1261_v15, 0.0  ;;  %v1315_v58 = vpack.c.bf16 %v1297_v5, %v1295_v60 }
 0x38d   : > { %v1263_v21 = vpop.f32.mrf.mxu1 }
 0x38e   : > { %v1299_v13 = vmax.f32 %v1263_v21, 0.0 }
 0x38f   : > { %v1265_v20 = vpop.f32.mrf.mxu1 }
 0x390   : > { %v1300_v11 = vmax.f32 %v1265_v20, 0.0 }
 0x391   : > { %v1267_v35 = vpop.f32.mrf.mxu1 }
 0x392   : > { %v1301_v30 = vmax.f32 %v1267_v35, 0.0  ;;  %v1316_v12 = vpack.c.bf16 %v1300_v11, %v1298_v3 }
 0x394   : > { %v1317_v51 = vpack.c.bf16 %v1301_v30, %v1299_v13 }
 0x396   : > { %1319 = vmatprep.subr.bf16.mxu0 %v1317_v51 }
 0x397   : > { %1320 = vmatpush1.bf16.msra.mxu0 %v1316_v12 }
 0x398   : > { %1321 = vmatprep.subr.bf16.mxu0 %v1315_v58 }
 0x39b   : > { %1322 = vmatpush1.bf16.msra.mxu0 %v1314_v0 }
 0x39c   : > { %1323 = vmatprep.subr.bf16.mxu0 %v1313_v39 }
 0x39f   : > { %1324 = vmatpush1.bf16.msra.mxu0 %v1312_v23 }
 0x3a0   : > { %1325 = vmatprep.subr.bf16.mxu0 %v1311_v29 }
 0x3a3   : > { %1326 = vmatpush1.bf16.msra.mxu0 %v1310_v56 }
 0x3a4   : > { %1327 = vmatprep.subr.bf16.mxu0 %v1309_v62 }
 0x3a7   : > { %1328 = vmatpush1.bf16.msra.mxu0 %v1308_v27 }
 0x3a8   : > { %1329 = vmatprep.subr.bf16.mxu0 %v1307_v25 }
 0x3ab   : > { %1330 = vmatpush1.bf16.msra.mxu0 %v1306_v50 }
 0x3ac   : > { %1331 = vmatprep.subr.bf16.mxu0 %v2176_v44 }
 0x3af   : > { %1332 = vmatpush1.bf16.msra.mxu0 %v2172_v14 }
 0x3b0   : > { %1333 = vmatprep.subr.bf16.mxu0 %v2170_v61 }
 0x3b3   : > { %1334 = vmatpush1.bf16.msra.mxu0 %v2168_v9 }
 0x3b6   : > { %1352 = vmatmul.mubr.bf16.vlgmr.msra.gmra.mxu0 %v1318_v42 }
 0x476   : > { %v1353_v31 = vpop.f32.mrf.mxu0 }
 0x477   : > { %v1360_v44 = vadd.f32 %v1353_v31, %v2163_v53 }
 0x478   : > { %v1355_v46 = vpop.f32.mrf.mxu0 }
 0x479   : > { %1362 = vst [vmem:[%s188_s11] sm:$0xff] %v1360_v44  ;;  %v1361_v61 = vadd.f32 %v1355_v46, %v2166_v59 }
 0x47a   : > { %v1357_v9 = vpop.f32.mrf.mxu0 }
 0x47b   : > { %1363 = vst [vmem:[%s188_s11 + $0x8] sm:$0xff] %v1361_v61 }
 0x47c   : > { %v1358_v14 = vpop.f32.mrf.mxu0 }
 0x47d   : > { %1637 = shalt.err (!%p1634_p5)
}
 0x47e   : > { %s1638_s30 = scalar_lea.hbm %s2202_s23, 256  ;;  %s1642_s6 = scalar_lea.hbm %s2251_s3, 512 }
 0x47f   : > { %p1639_p6 = scmp.ne.s32.totalorder %s2202_s23, %s1638_s30  ;;  %p1643_p10 = scmp.lt.s32.totalorder %s2202_s23, %s2251_s3 }
 0x480   : > { %p1644_p11 = scmp.lt.s32.totalorder %s1642_s6, %s1638_s30 }
 0x481   : > { %p1640_p7 = pnand %p1639_p6, %p1764_p4 }
 0x482   : > { %p1645_p12 = por %p1644_p11, %p1643_p10 }
 0x483   : > { %p1641_p9 = pneg %p1640_p7 }
 0x485   : > { %p1646_p13 = pnand %p1645_p12, %p1641_p9 }
 0x487   : > { %1649 = shalt.err (!%p1646_p13)
}
 0x488   : > { %1536 = dma.vmem_to_hbm [thread:$0]  (%p1764_p4), %s2204_s18, 256, %s2202_s23, %s1365_s15  }
 0x489 PF: > { %p1542_p0 = scmp.ge.s32.totalorder %s1700_s17, 2  ;;  %s1393_s9 = sand.u32 1, %s1680_s12  }
 0x48a   : > { %s1394_s10 = scalar_lea.sflag [#allocation3], %s1393_s9 }
 0x48b   : > { %p1539_p1 = pnand %p1542_p0, %p1771_p8 }
 0x48d   : > { %p1540_p2 = pneg %p1539_p1 }
 0x48f   : > { %1675 = dma.done.wait (%p1540_p2), %s1394_s10, 256  }
 0x490   : > { %1677 = vsyncadd (%p1540_p2), %s1394_s10, 4294967040  ;;  %s16_s17 = sadd.s32 1, %s1700_s17   ;;  %s2309_s12 = smov %s1684_s13 }
 0x491   : > { %p13_p3 = scmp.ge.s32.totalorder %s16_s17, 4   ;;  %s2310_s13 = smov %s1688_s14 }
 0x492   : > { %s2311_s14 = smov %s1777_s25  ;;  %s2312_s15 = smov %s1696_s16 }
 0x493   : > { %s2313_s16 = smov %s2315_s20  ;;  %15 = sbr.rel (!%p13_p3) target bundleno = 4 (0x4), region = 67 }
 0x498   :  { %1399 = vsyncpa [#allocation3], 1 }
 0x499   :  { %1401 = vsyncpa [#allocation3 + $0x1], 1 }

</bundles_post_ra>
